<compile_context>
chip_gen: v6e
topology: v6e:2x2x1
jax: 0.10.0
libtpu: 0.0.40
codegen_flags: <defaults>
</compile_context>

<pallas_src>
import math
import functools

import jax
import jax.numpy as jnp
from jax.experimental import pallas as pl
from jax.experimental.pallas import tpu as pltpu

MANO_POSE_NUM = 45                    # config.mano_pose_num
ROT_DIM = 3
OUT_DIM = ROT_DIM + MANO_POSE_NUM     # 48 real output columns
OUT_PAD = 128                         # lane-dense padded output width


def _round_up(n, m):
    return ((n + m - 1) // m) * m


def _mano_theta_kernel(x_ref, w1_ref, b1_ref, w2_ref, b2_ref, hs_ref, out_ref):
    # ---- fused layer 1: one MXU matmul for both heads, bias + ReLU in f32 ----
    h = jnp.dot(x_ref[...], w1_ref[...], preferred_element_type=jnp.float32)
    h = jnp.maximum(h + b1_ref[...], 0.0)

    # ---- fused layer 2: block-diagonal (pre-halved) weight -> (bm, 128) ------
    # z_half = 0.5 * (h @ W2 + b2); the 0.5 was folded into w2_ref / b2_ref.
    z_half = jnp.dot(h.astype(w2_ref.dtype), w2_ref[...],
                     preferred_element_type=jnp.float32) + b2_ref[...]

    # scale * (sigmoid(z) - 0.5) == half_scale * tanh(z/2)   (exact)
    out_ref[...] = (hs_ref[...] * jnp.tanh(z_half)).astype(out_ref.dtype)


def pack_params(params, dtype=jnp.float32):
    """Pack the 8 per-head tensors into fused kernel operands (done once).

    dtype controls the *streamed / matmul* dtype of the weights (and of x, cast in
    the wrapper).  Biases and the angle-range scale stay f32.
    """
    w1a, b1a, w1b, b1b = params["w1a"], params["b1a"], params["w1b"], params["b1b"]
    w2a, b2a, w2b, b2b = params["w2a"], params["b2a"], params["w2b"], params["b2b"]
    h1 = w1a.shape[1]
    h2 = w2a.shape[1]

    # Layer 1: concatenated heads.
    w1 = jnp.concatenate([w1a, w2a], axis=1).astype(dtype)          # (F, h1+h2)
    b1 = jnp.concatenate([b1a, b2a], axis=1).astype(jnp.float32)    # (1, h1+h2)

    # Layer 2: block-diagonal, pre-multiplied by 0.5 (tanh identity), zero-padded
    # to 128 output columns so the kernel's store is lane-dense.
    w2 = jnp.zeros((h1 + h2, OUT_PAD), dtype=jnp.float32)
    w2 = w2.at[:h1, :ROT_DIM].set(0.5 * w1b)
    w2 = w2.at[h1:, ROT_DIM:OUT_DIM].set(0.5 * w2b)
    w2 = w2.astype(dtype)

    b2 = jnp.zeros((1, OUT_PAD), dtype=jnp.float32)
    b2 = b2.at[:, :ROT_DIM].set(0.5 * b1b)
    b2 = b2.at[:, ROT_DIM:OUT_DIM].set(0.5 * b2b)

    # half_scale = 0.5 * angle-range scale: root -> pi (=0.5*2pi), other -> pi/2.
    half_scale = jnp.zeros((1, OUT_PAD), dtype=jnp.float32)
    half_scale = half_scale.at[:, :ROT_DIM].set(math.pi)
    half_scale = half_scale.at[:, ROT_DIM:OUT_DIM].set(0.5 * math.pi)

    return {"w1": w1, "b1": b1, "w2": w2, "b2": b2, "half_scale": half_scale}


@functools.partial(jax.jit, static_argnames=("bm",))
def mano_theta_prediction(x, packed, *, bm=1024):
    """x: (B, input_dim).  Returns (root_angles (B, 3), other_angles (B, 45))."""
    B, F = x.shape
    w1, b1, w2, b2, hs = (packed["w1"], packed["b1"], packed["w2"],
                          packed["b2"], packed["half_scale"])

    # Stream x in the weight dtype (bf16 halves HBM traffic on the only big stream;
    # ideally the upstream producer already emits bf16).
    x = x.astype(w1.dtype)

    # Batch-tile alignment: sublane packing is 8 rows for 32-bit, 16 for 16-bit.
    align = 8 * (4 // jnp.dtype(x.dtype).itemsize)
    bm = max(align, _round_up(min(bm, B), align))

    # Conservative VMEM budget (safe for v7x 32 MiB scoped default): double-buffered
    # x tile + double-buffered f32 output slab.
    bytes_per_row = 2 * F * jnp.dtype(x.dtype).itemsize + 2 * OUT_PAD * 4
    max_bm = max(align, (24 * 1024 * 1024 // max(bytes_per_row, 1)) // align * align)
    bm = min(bm, max_bm)

    grid = (pl.cdiv(B, bm),)   # ragged last block handled by Pallas (no jnp.pad)

    out = pl.pallas_call(
        _mano_theta_kernel,
        out_shape=jax.ShapeDtypeStruct((B, OUT_PAD), jnp.float32),
        grid=grid,
        in_specs=[
            pl.BlockSpec((bm, F), lambda i: (i, 0)),        # x: streamed
            pl.BlockSpec(w1.shape, lambda i: (0, 0)),       # weights: resident
            pl.BlockSpec(b1.shape, lambda i: (0, 0)),
            pl.BlockSpec(w2.shape, lambda i: (0, 0)),
            pl.BlockSpec(b2.shape, lambda i: (0, 0)),
            pl.BlockSpec(hs.shape, lambda i: (0, 0)),
        ],
        out_specs=pl.BlockSpec((bm, OUT_PAD), lambda i: (i, 0)),   # lane-dense
        compiler_params=pltpu.CompilerParams(
            dimension_semantics=("parallel",)),
    )(x, w1, b1, w2, b2, hs)

    theta = out[:, :OUT_DIM]
    root_angles = theta[:, :ROT_DIM]
    other_angles = theta[:, ROT_DIM:]
    return root_angles, other_angles


def init_params(key, input_dim):
    """PyTorch-Linear-style init: U(-1/sqrt(fan_in), 1/sqrt(fan_in)).

    Weights stored as (in_features, out_features) — already transposed for the
    in-kernel `x @ W` matmul (checkpoint loading from PyTorch must transpose).
    """
    h1 = input_dim // 4  # build_sequtial(..., factor=4) hidden width
    h2 = input_dim // 2  # build_sequtial(..., factor=2) hidden width

    def linear(key, fan_in, fan_out):
        kw, kb = jax.random.split(key)
        bound = 1.0 / math.sqrt(fan_in)
        w = jax.random.uniform(kw, (fan_in, fan_out), jnp.float32, -bound, bound)
        b = jax.random.uniform(kb, (1, fan_out), jnp.float32, -bound, bound)
        return w, b

    k1, k2, k3, k4 = jax.random.split(key, 4)
    w1a, b1a = linear(k1, input_dim, h1)
    w1b, b1b = linear(k2, h1, ROT_DIM)
    w2a, b2a = linear(k3, input_dim, h2)
    w2b, b2b = linear(k4, h2, MANO_POSE_NUM)
    return {
        "w1a": w1a, "b1a": b1a, "w1b": w1b, "b1b": b1b,
        "w2a": w2a, "b2a": b2a, "w2b": w2b, "b2b": b2b,
    }


def reference(x, params):
    """Pure-JAX reference of the original (unfused) forward pass."""
    h1 = jnp.maximum(x @ params["w1a"] + params["b1a"], 0.0)
    r = jax.nn.sigmoid(h1 @ params["w1b"] + params["b1b"])
    root = (r - 0.5) * 2.0 * math.pi
    h2 = jnp.maximum(x @ params["w2a"] + params["b2a"], 0.0)
    o = jax.nn.sigmoid(h2 @ params["w2b"] + params["b2b"])
    other = (o - 0.5) * math.pi
    return root, other


if __name__ == "__main__":
    input_dim = 32
    key = jax.random.PRNGKey(0)
    k_x1, k_x2, k_p = jax.random.split(key, 3)
    params = init_params(k_p, input_dim)

    # ---- path 1: f32 weights/stream, batch divisible by the tile -------------
    batch = 8
    x = jax.random.normal(k_x1, (batch, input_dim), jnp.float32)
    packed_f32 = pack_params(params, dtype=jnp.float32)
    root_angles, other_angles = mano_theta_prediction(x, packed_f32)
    jax.block_until_ready((root_angles, other_angles))

    root_ref, other_ref = reference(x, params)
    assert root_angles.shape == (batch, ROT_DIM)
    assert other_angles.shape == (batch, MANO_POSE_NUM)
    # tanh formulation is exact -> tight tolerance
    assert jnp.allclose(root_angles, root_ref, atol=1e-4), (
        float(jnp.max(jnp.abs(root_angles - root_ref))))
    assert jnp.allclose(other_angles, other_ref, atol=1e-4), (
        float(jnp.max(jnp.abs(other_angles - other_ref))))

    # ---- path 2: bf16 streaming + ragged batch (exercises cdiv grid, no pad) -
    batch2 = 37
    x2 = jax.random.normal(k_x2, (batch2, input_dim), jnp.float32)
    packed_bf16 = pack_params(params, dtype=jnp.bfloat16)
    root2, other2 = mano_theta_prediction(x2, packed_bf16)
    jax.block_until_ready((root2, other2))

    root_ref2, other_ref2 = reference(x2, params)
    assert root2.shape == (batch2, ROT_DIM)
    assert other2.shape == (batch2, MANO_POSE_NUM)
    # bf16 input/weight quantization only -> loose but comfortable tolerance
    assert jnp.allclose(root2, root_ref2, atol=5e-2), (
        float(jnp.max(jnp.abs(root2 - root_ref2))))
    assert jnp.allclose(other2, other_ref2, atol=5e-2), (
        float(jnp.max(jnp.abs(other2 - other_ref2))))

    print("KERNEL_OK")
</pallas_src>

<mosaic_0001>
module attributes {stable_mosaic.version = 11 : i64} {
  func.func @_mano_theta_kernel(%arg0: i32, %arg1: memref<8x32xf32, #tpu.memory_space<vmem>>, %arg2: memref<32x24xf32, #tpu.memory_space<vmem>>, %arg3: memref<1x24xf32, #tpu.memory_space<vmem>>, %arg4: memref<24x128xf32, #tpu.memory_space<vmem>>, %arg5: memref<1x128xf32, #tpu.memory_space<vmem>>, %arg6: memref<1x128xf32, #tpu.memory_space<vmem>>, %arg7: memref<8x128xf32, #tpu.memory_space<vmem>>) attributes {dimension_semantics = [#tpu.dimension_semantics<parallel>], iteration_bounds = array<i64: 1>, scalar_prefetch = 0 : i64, scratch_operands = 0 : i64, tpu.core_type = #tpu.core_type<tc>, window_params = [{transform_indices = @transform_0, window_bounds = array<i64: 8, 32>}, {pipeline_mode = #tpu.pipeline_mode<synchronous>, transform_indices = @transform_1, window_bounds = array<i64: 32, 24>}, {pipeline_mode = #tpu.pipeline_mode<synchronous>, transform_indices = @transform_2, window_bounds = array<i64: 1, 24>}, {pipeline_mode = #tpu.pipeline_mode<synchronous>, transform_indices = @transform_3, window_bounds = array<i64: 24, 128>}, {pipeline_mode = #tpu.pipeline_mode<synchronous>, transform_indices = @transform_4, window_bounds = array<i64: 1, 128>}, {pipeline_mode = #tpu.pipeline_mode<synchronous>, transform_indices = @transform_5, window_bounds = array<i64: 1, 128>}, {transform_indices = @transform_6, window_bounds = array<i64: 8, 128>}]} {
    %c0 = arith.constant 0 : index
    %c0_0 = arith.constant 0 : index
    %0 = vector.load %arg1[%c0, %c0_0] : memref<8x32xf32, #tpu.memory_space<vmem>>, vector<8x32xf32>
    %c0_1 = arith.constant 0 : index
    %c0_2 = arith.constant 0 : index
    %1 = vector.load %arg2[%c0_1, %c0_2] : memref<32x24xf32, #tpu.memory_space<vmem>>, vector<32x24xf32>
    %cst = arith.constant dense<0.000000e+00> : vector<8x24xf32>
    %2 = tpu.matmul %0, %1, %cst {dimension_numbers = #tpu.dot_dimension_numbers<[1], [0], [0], [1], [0, 0, 1, 1], [], []>} : vector<8x32xf32>, vector<32x24xf32>, vector<8x24xf32> -> vector<8x24xf32>
    %c0_3 = arith.constant 0 : index
    %c0_4 = arith.constant 0 : index
    %3 = vector.load %arg3[%c0_3, %c0_4] : memref<1x24xf32, #tpu.memory_space<vmem>>, vector<1x24xf32>
    %4 = vector.broadcast %3 : vector<1x24xf32> to vector<8x24xf32>
    %5 = arith.addf %2, %4 : vector<8x24xf32>
    %cst_5 = arith.constant 0.000000e+00 : f32
    %6 = vector.broadcast %cst_5 : f32 to vector<8x24xf32>
    %7 = arith.maximumf %5, %6 : vector<8x24xf32>
    %c0_6 = arith.constant 0 : index
    %c0_7 = arith.constant 0 : index
    %8 = vector.load %arg4[%c0_6, %c0_7] : memref<24x128xf32, #tpu.memory_space<vmem>>, vector<24x128xf32>
    %cst_8 = arith.constant dense<0.000000e+00> : vector<8x128xf32>
    %9 = tpu.matmul %7, %8, %cst_8 {dimension_numbers = #tpu.dot_dimension_numbers<[1], [0], [0], [1], [0, 0, 1, 1], [], []>} : vector<8x24xf32>, vector<24x128xf32>, vector<8x128xf32> -> vector<8x128xf32>
    %c0_9 = arith.constant 0 : index
    %c0_10 = arith.constant 0 : index
    %10 = vector.load %arg5[%c0_9, %c0_10] : memref<1x128xf32, #tpu.memory_space<vmem>>, vector<1x128xf32>
    %11 = vector.broadcast %10 : vector<1x128xf32> to vector<8x128xf32>
    %12 = arith.addf %9, %11 : vector<8x128xf32>
    %c0_11 = arith.constant 0 : index
    %c0_12 = arith.constant 0 : index
    %13 = vector.load %arg6[%c0_11, %c0_12] : memref<1x128xf32, #tpu.memory_space<vmem>>, vector<1x128xf32>
    %14 = math.tanh %12 : vector<8x128xf32>
    %15 = vector.broadcast %13 : vector<1x128xf32> to vector<8x128xf32>
    %16 = arith.mulf %15, %14 : vector<8x128xf32>
    %c0_13 = arith.constant 0 : index
    %c0_14 = arith.constant 0 : index
    %17 = vector.load %arg7[%c0_13, %c0_14] : memref<8x128xf32, #tpu.memory_space<vmem>>, vector<8x128xf32>
    tpu.vector_store %arg7[%c0_13, %c0_14], %16 {strides = array<i32>} : memref<8x128xf32, #tpu.memory_space<vmem>>, vector<8x128xf32>,
    return
  }
  func.func @transform_0(%arg0: i32) -> (i32, i32) {
    %c0_i32 = arith.constant 0 : i32
    %c0_i32_0 = arith.constant 0 : i32
    return %arg0, %c0_i32 : i32, i32
  }
  func.func @transform_1(%arg0: i32) -> (i32, i32) {
    %c0_i32 = arith.constant 0 : i32
    %c0_i32_0 = arith.constant 0 : i32
    %c0_i32_1 = arith.constant 0 : i32
    return %c0_i32, %c0_i32_0 : i32, i32
  }
  func.func @transform_2(%arg0: i32) -> (i32, i32) {
    %c0_i32 = arith.constant 0 : i32
    %c0_i32_0 = arith.constant 0 : i32
    %c0_i32_1 = arith.constant 0 : i32
    return %c0_i32, %c0_i32_0 : i32, i32
  }
  func.func @transform_3(%arg0: i32) -> (i32, i32) {
    %c0_i32 = arith.constant 0 : i32
    %c0_i32_0 = arith.constant 0 : i32
    %c0_i32_1 = arith.constant 0 : i32
    return %c0_i32, %c0_i32_0 : i32, i32
  }
  func.func @transform_4(%arg0: i32) -> (i32, i32) {
    %c0_i32 = arith.constant 0 : i32
    %c0_i32_0 = arith.constant 0 : i32
    %c0_i32_1 = arith.constant 0 : i32
    return %c0_i32, %c0_i32_0 : i32, i32
  }
  func.func @transform_5(%arg0: i32) -> (i32, i32) {
    %c0_i32 = arith.constant 0 : i32
    %c0_i32_0 = arith.constant 0 : i32
    %c0_i32_1 = arith.constant 0 : i32
    return %c0_i32, %c0_i32_0 : i32, i32
  }
  func.func @transform_6(%arg0: i32) -> (i32, i32) {
    %c0_i32 = arith.constant 0 : i32
    %c0_i32_0 = arith.constant 0 : i32
    return %arg0, %c0_i32 : i32, i32
  }
}

</mosaic_0001>

<bundles_post_ra>
// kernel: mano_theta_prediction.1
= control target key start
LH: loop header
LB: loop body
LE: loop exit
PB: predicated region body
PF: predicated region fallthrough
CT: control target
= control target key end

     0   :  { %v246_v0 = vmov 0.0   ;;  %vm247_vm0 = vmmov 0   ;;  %vm35_vm1 = vcmask 261120   ;;  %vm120_vm2 = vcmask 195584   ;;  %s319_s1 = inlined_call_operand.vmem [shape: f32[32,24], index: 1, kind: input, shape index: {}]   ;;  %s320_s0 = inlined_call_operand.vmem [shape: f32[8,32], index: 0, kind: input, shape index: {}]   ;;  %s321_s3 = inlined_call_operand.vmem [shape: f32[24,128], index: 3, kind: input, shape index: {}]   ;;  %s322_s2 = inlined_call_operand.vmem [shape: f32[1,24], index: 2, kind: input, shape index: {}]   ;;  %s323_s4 = inlined_call_operand.vmem [shape: f32[1,128], index: 4, kind: input, shape index: {}]   ;;  %s324_s5 = inlined_call_operand.vmem [shape: f32[1,128], index: 5, kind: input, shape index: {}]   ;;  %s325_s6 = inlined_call_operand.vmem [shape: f32[8,128], index: 6, kind: output, shape index: {}]  }
   0x1   :  { %222 = vmatprep.subr.mxu0 %v246_v0  ;;  %v27_v1 = vld [vmem:[%s319_s1 + $0x18] sm:$0xff]  ;;  %v26_v2 = vld [vmem:[%s319_s1 + $0x10] sm:$0xff]  ;;  %230 = vmatprep.mubr.msk.f32.mxu0 %vm247_vm0, %v246_v0  ;;  %v25_v3 = vld [vmem:[%s319_s1 + $0x8] sm:$0xff] }
   0x2   :  { %223 = vmatpush3.msra.mxu0 %v27_v1  ;;  %233 = vmatprep.subr.mxu1 %v246_v0  ;;  %v24_v4 = vld [vmem:[%s319_s1] sm:$0xff]  ;;  %v112_v6 = vld [vmem:[%s321_s3 + $0x10] sm:$0xff]  ;;  %v111_v7 = vld [vmem:[%s321_s3 + $0x8] sm:$0xff] }
   0x3   :  { %224 = vmatprep.subr.mxu0 %v246_v0  ;;  %239 = vmatprep.mubr.msk.f32.mxu1 %vm247_vm0, %v246_v0  ;;  %v23_v5 = vld [vmem:[%s320_s0] sm:$0xff] }
   0x4   :  { %225 = vmatpush3.msra.mxu0 %v26_v2  ;;  %234 = vmatpush3.msra.mxu1 %v112_v6  ;;  %v110_v8 = vld [vmem:[%s321_s3] sm:$0xff] }
   0x5   :  { %226 = vmatprep.subr.mxu0 %v246_v0  ;;  %235 = vmatprep.subr.mxu1 %v246_v0  ;;  %v208_v9 = vld [vmem:[%s322_s2] ss:$0 sm:$0xff] }
   0x6   :  { %227 = vmatpush3.msra.mxu0 %v25_v3  ;;  %236 = vmatpush3.msra.mxu1 %v111_v7  ;;  %v210_v14 = vld [vmem:[%s323_s4] ss:$0 sm:$0xff] }
   0x7   :  { %228 = vmatprep.subr.mxu0 %v246_v0  ;;  %237 = vmatprep.subr.mxu1 %v246_v0  ;;  %v212_v18 = vld [vmem:[%s324_s5] ss:$0 sm:$0xff] }
   0x8   :  { %229 = vmatpush3.msra.mxu0 %v24_v4  ;;  %238 = vmatpush3.msra.mxu1 %v110_v8 }
   0x9   :  { %231 = vmatmul.mubr.msk.f32.vlgmr.msra.gmra.mxu0 %vm35_vm1, %v23_v5 }
  0xc9   :  { %v105_v10 = vpop.f32.mrf.mxu0 }
  0xca   :  { %v106_v11 = vadd.f32 %v208_v9, %v105_v10 }
  0xcb   :  { %v232_v12 = vpop.f32.mrf.mxu0 }
  0xcc   :  { %v109_v13 = vmax.f32 %v106_v11, 0.0 }
  0xce   :  { %240 = vmatmul.mubr.msk.f32.vlgmr.msra.gmra.mxu1 %vm120_vm2, %v109_v13 }
 0x18e   :  { %v190_v15 = vpop.f32.mrf.mxu1 }
 0x18f   :  { %v191_v16 = vadd.f32 %v210_v14, %v190_v15 }
 0x190   :  { %v241_v17 = vpop.f32.mrf.mxu1 }
 0x191   :  { %244 = vtanh.f32 %v191_v16 }
 0x19e   :  { %v245_v19 = vpop.eup %244 }
 0x19f   :  { %v202_v20 = vmul.f32 %v245_v19, %v212_v18 }
 0x1a1   :  { %203 = vst [vmem:[%s325_s6] sm:$0xff] %v202_v20 }

</bundles_post_ra>
